<compile_context>
chip_gen: v6e
topology: v6e:2x2x1
jax: 0.10.0
libtpu: 0.0.40
codegen_flags: <defaults>
</compile_context>

<pallas_src>
import jax
import jax.numpy as jnp
from jax.experimental import pallas as pl
from jax.experimental.pallas import tpu as pltpu

IN_FEATURES = 128
OUT_FEATURES = 10
TILE_M_MAX = 1024  # rows per grid step for large batches


def _round_up(n, m):
    return ((n + m - 1) // m) * m


def linear_kernel(x_ref, w_ref, b_ref, o_ref):
    # Hot path: one MXU matmul + one VPU bias add + cast. Keep the epilogue
    # minimal so the store slot (masked 10-wide vst) stays the only limiter.
    acc = jnp.dot(x_ref[...], w_ref[...], preferred_element_type=jnp.float32)
    o_ref[...] = (acc + b_ref[...]).astype(o_ref.dtype)


def classifier_forward(x, w, b):
    """x: (B, 128) f32, w: (128, 10) f32, b: (1, 10) f32 -> (B, 10) f32."""
    B = x.shape[0]

    # Tile the batch: full batch in one step if small (rounded to the f32
    # sublane multiple of 8), otherwise TILE_M_MAX-row tiles.
    tile_m = min(TILE_M_MAX, _round_up(B, 8))
    b_pad = _round_up(B, tile_m)
    if b_pad != B:
        x = jnp.pad(x, ((0, b_pad - B), (0, 0)))

    grid = (b_pad // tile_m,)

    out = pl.pallas_call(
        linear_kernel,
        out_shape=jax.ShapeDtypeStruct((b_pad, OUT_FEATURES), jnp.float32),
        grid=grid,
        in_specs=[
            # x: one batch tile per grid step (double-buffered by Pallas).
            pl.BlockSpec((tile_m, IN_FEATURES), lambda i: (i, 0)),
            # W and b: constant index_map -> DMA'd once, stay resident.
            pl.BlockSpec((IN_FEATURES, OUT_FEATURES), lambda i: (0, 0)),
            pl.BlockSpec((1, OUT_FEATURES), lambda i: (0, 0)),
        ],
        out_specs=pl.BlockSpec((tile_m, OUT_FEATURES), lambda i: (i, 0)),
        compiler_params=pltpu.CompilerParams(
            dimension_semantics=("parallel",),
        ),
        cost_estimate=pl.CostEstimate(
            flops=2 * b_pad * IN_FEATURES * OUT_FEATURES,
            transcendentals=0,
            bytes_accessed=(
                b_pad * IN_FEATURES * 4            # x read
                + b_pad * OUT_FEATURES * 4         # out write
                + IN_FEATURES * OUT_FEATURES * 4   # W read
                + OUT_FEATURES * 4                 # b read
            ),
        ),
    )(x, w, b)

    return out[:B] if b_pad != B else out


def init_params(key):
    # Mimic PyTorch nn.Linear default init: U(-1/sqrt(fan_in), 1/sqrt(fan_in)).
    kw, kb = jax.random.split(key)
    bound = 1.0 / jnp.sqrt(jnp.float32(IN_FEATURES))
    # Stored already transposed relative to PyTorch's (out, in) layout.
    w = jax.random.uniform(
        kw, (IN_FEATURES, OUT_FEATURES), jnp.float32, -bound, bound
    )
    b = jax.random.uniform(
        kb, (1, OUT_FEATURES), jnp.float32, -bound, bound
    )
    return w, b


if __name__ == "__main__":
    key = jax.random.PRNGKey(0)
    kx, kp, kx2 = jax.random.split(key, 3)

    w, b = init_params(kp)

    # Small batch (matches the module's expected tiny-input usage).
    B = 2
    x = jax.random.normal(kx, (B, IN_FEATURES), jnp.float32)
    out = jax.block_until_ready(classifier_forward(x, w, b))
    ref = x @ w + b
    assert out.shape == (B, OUT_FEATURES)
    assert jnp.allclose(out, ref, atol=1e-5, rtol=1e-5)

    # Larger batch to exercise the tiled / pipelined grid path.
    B2 = 4096
    x2 = jax.random.normal(kx2, (B2, IN_FEATURES), jnp.float32)
    out2 = jax.block_until_ready(classifier_forward(x2, w, b))
    ref2 = x2 @ w + b
    assert out2.shape == (B2, OUT_FEATURES)
    assert jnp.allclose(out2, ref2, atol=1e-5, rtol=1e-5)

    print("KERNEL_OK")
</pallas_src>

<mosaic_0001>
module attributes {stable_mosaic.version = 11 : i64} {
  func.func @linear_kernel(%arg0: i32, %arg1: memref<8x128xf32, #tpu.memory_space<vmem>>, %arg2: memref<128x10xf32, #tpu.memory_space<vmem>>, %arg3: memref<1x10xf32, #tpu.memory_space<vmem>>, %arg4: memref<8x10xf32, #tpu.memory_space<vmem>>) attributes {dimension_semantics = [#tpu.dimension_semantics<parallel>], iteration_bounds = array<i64: 1>, scalar_prefetch = 0 : i64, scratch_operands = 0 : i64, tpu.core_type = #tpu.core_type<tc>, window_params = [{transform_indices = @transform_0, window_bounds = array<i64: 8, 128>}, {pipeline_mode = #tpu.pipeline_mode<synchronous>, transform_indices = @transform_1, window_bounds = array<i64: 128, 10>}, {pipeline_mode = #tpu.pipeline_mode<synchronous>, transform_indices = @transform_2, window_bounds = array<i64: 1, 10>}, {transform_indices = @transform_3, window_bounds = array<i64: 8, 10>}]} {
    %c0 = arith.constant 0 : index
    %c0_0 = arith.constant 0 : index
    %0 = vector.load %arg1[%c0, %c0_0] : memref<8x128xf32, #tpu.memory_space<vmem>>, vector<8x128xf32>
    %c0_1 = arith.constant 0 : index
    %c0_2 = arith.constant 0 : index
    %1 = vector.load %arg2[%c0_1, %c0_2] : memref<128x10xf32, #tpu.memory_space<vmem>>, vector<128x10xf32>
    %cst = arith.constant dense<0.000000e+00> : vector<8x10xf32>
    %2 = tpu.matmul %0, %1, %cst {dimension_numbers = #tpu.dot_dimension_numbers<[1], [0], [0], [1], [0, 0, 1, 1], [], []>} : vector<8x128xf32>, vector<128x10xf32>, vector<8x10xf32> -> vector<8x10xf32>
    %c0_3 = arith.constant 0 : index
    %c0_4 = arith.constant 0 : index
    %3 = vector.load %arg3[%c0_3, %c0_4] : memref<1x10xf32, #tpu.memory_space<vmem>>, vector<1x10xf32>
    %4 = vector.broadcast %3 : vector<1x10xf32> to vector<8x10xf32>
    %5 = arith.addf %2, %4 : vector<8x10xf32>
    %c0_5 = arith.constant 0 : index
    %c0_6 = arith.constant 0 : index
    %6 = vector.load %arg4[%c0_5, %c0_6] : memref<8x10xf32, #tpu.memory_space<vmem>>, vector<8x10xf32>
    tpu.vector_store %arg4[%c0_5, %c0_6], %5 {strides = array<i32>} : memref<8x10xf32, #tpu.memory_space<vmem>>, vector<8x10xf32>,
    return
  }
  func.func @transform_0(%arg0: i32) -> (i32, i32) {
    %c0_i32 = arith.constant 0 : i32
    %c0_i32_0 = arith.constant 0 : i32
    return %arg0, %c0_i32 : i32, i32
  }
  func.func @transform_1(%arg0: i32) -> (i32, i32) {
    %c0_i32 = arith.constant 0 : i32
    %c0_i32_0 = arith.constant 0 : i32
    %c0_i32_1 = arith.constant 0 : i32
    return %c0_i32, %c0_i32_0 : i32, i32
  }
  func.func @transform_2(%arg0: i32) -> (i32, i32) {
    %c0_i32 = arith.constant 0 : i32
    %c0_i32_0 = arith.constant 0 : i32
    %c0_i32_1 = arith.constant 0 : i32
    return %c0_i32, %c0_i32_0 : i32, i32
  }
  func.func @transform_3(%arg0: i32) -> (i32, i32) {
    %c0_i32 = arith.constant 0 : i32
    %c0_i32_0 = arith.constant 0 : i32
    return %arg0, %c0_i32 : i32, i32
  }
}

</mosaic_0001>

<bundles_post_ra>
// kernel: tpu_custom_call.1
= control target key start
LH: loop header
LB: loop body
LE: loop exit
PB: predicated region body
PF: predicated region fallthrough
CT: control target
= control target key end

     0   :  { %v203_v1 = vmov 0.0   ;;  %vm204_vm0 = vmmov 0   ;;  %s283_s0 = inlined_call_operand.vmem [shape: f32[8,128], index: 0, kind: input, shape index: {}]   ;;  %s284_s1 = inlined_call_operand.vmem [shape: f32[128,10], index: 1, kind: input, shape index: {}]   ;;  %s285_s2 = inlined_call_operand.vmem [shape: f32[1,10], index: 2, kind: input, shape index: {}]   ;;  %s286_s3 = inlined_call_operand.hbm [shape: f32[8,10], index: 3, kind: output, shape index: {}]  }
   0x1   :  { %v31_v0 = vld [vmem:[%s284_s1 + $0x78] sm:$0xff]  ;;  %143 = vmatprep.subr.mxu0 %v203_v1  ;;  %v30_v2 = vld [vmem:[%s284_s1 + $0x70] sm:$0xff]  ;;  %175 = vmatprep.mubr.msk.f32.mxu0 %vm204_vm0, %v203_v1  ;;  %v29_v3 = vld [vmem:[%s284_s1 + $0x68] sm:$0xff] }
   0x2   :  { %144 = vmatpush3.msra.mxu0 %v31_v0  ;;  %v28_v4 = vld [vmem:[%s284_s1 + $0x60] sm:$0xff] }
   0x3   :  { %145 = vmatprep.subr.mxu0 %v203_v1 }
   0x4   :  { %146 = vmatpush3.msra.mxu0 %v30_v2 }
   0x5   :  { %147 = vmatprep.subr.mxu0 %v203_v1 }
   0x6   :  { %148 = vmatpush3.msra.mxu0 %v29_v3 }
   0x7   :  { %8 = vsyncpa [#allocation3], 0  ;;  %149 = vmatprep.subr.mxu0 %v203_v1  ;;  %v27_v5 = vld [vmem:[%s284_s1 + $0x58] sm:$0xff]  ;;  %v26_v6 = vld [vmem:[%s284_s1 + $0x50] sm:$0xff]  ;;  %s205_s21 = smov [#allocation2]   ;;  %vm109_vm1 = vcmask 80896  }
   0x8   :  { %150 = vmatpush3.msra.mxu0 %v28_v4  ;;  %v25_v7 = vld [vmem:[%s284_s1 + $0x48] sm:$0xff]  ;;  %v24_v8 = vld [vmem:[%s284_s1 + $0x40] sm:$0xff]  ;;  %v23_v9 = vld [vmem:[%s284_s1 + $0x38] sm:$0xff]  ;;  %s117_s22 = sshll.u32 %s205_s21, 4  ;;  %s118_s22 = int_to_ptr.vmem [resolvable:$true] %s117_s22 }
   0x9   :  { %151 = vmatprep.subr.mxu0 %v203_v1  ;;  %v22_v10 = vld [vmem:[%s284_s1 + $0x30] sm:$0xff]  ;;  %v21_v11 = vld [vmem:[%s284_s1 + $0x28] sm:$0xff]  ;;  %v20_v12 = vld [vmem:[%s284_s1 + $0x20] sm:$0xff]  ;;  %p186_p1 = scmp.lt.s32.totalorder %s118_s22, %s118_s22 }
   0xa   :  { %152 = vmatpush3.msra.mxu0 %v27_v5  ;;  %v19_v13 = vld [vmem:[%s284_s1 + $0x18] sm:$0xff]  ;;  %v18_v14 = vld [vmem:[%s284_s1 + $0x10] sm:$0xff]  ;;  %v17_v15 = vld [vmem:[%s284_s1 + $0x8] sm:$0xff] }
   0xb   :  { %153 = vmatprep.subr.mxu0 %v203_v1  ;;  %v16_v16 = vld [vmem:[%s284_s1] sm:$0xff]  ;;  %s181_s1 = scalar_lea.vmem %s118_s22, 128 }
   0xc   :  { %154 = vmatpush3.msra.mxu0 %v26_v6  ;;  %v15_v17 = vld [vmem:[%s283_s0] sm:$0xff]  ;;  %p182_p0 = scmp.ne.s32.totalorder %s118_s22, %s181_s1  ;;  %p187_p2 = scmp.lt.s32.totalorder %s181_s1, %s181_s1 }
   0xd   :  { %155 = vmatprep.subr.mxu0 %v203_v1  ;;  %v125_v18 = vld [vmem:[%s285_s2] ss:$0 sm:$0xff] }
   0xe   :  { %156 = vmatpush3.msra.mxu0 %v25_v7  ;;  %p188_p3 = por %p187_p2, %p186_p1 }
   0xf   :  { %157 = vmatprep.subr.mxu0 %v203_v1 }
  0x10   :  { %158 = vmatpush3.msra.mxu0 %v24_v8  ;;  %p189_p4 = pnand %p188_p3, %p182_p0 }
  0x11   :  { %159 = vmatprep.subr.mxu0 %v203_v1 }
  0x12   :  { %160 = vmatpush3.msra.mxu0 %v23_v9 }
  0x13   :  { %161 = vmatprep.subr.mxu0 %v203_v1 }
  0x14   :  { %162 = vmatpush3.msra.mxu0 %v22_v10 }
  0x15   :  { %163 = vmatprep.subr.mxu0 %v203_v1 }
  0x16   :  { %164 = vmatpush3.msra.mxu0 %v21_v11 }
  0x17   :  { %165 = vmatprep.subr.mxu0 %v203_v1 }
  0x18   :  { %166 = vmatpush3.msra.mxu0 %v20_v12 }
  0x19   :  { %167 = vmatprep.subr.mxu0 %v203_v1 }
  0x1a   :  { %168 = vmatpush3.msra.mxu0 %v19_v13 }
  0x1b   :  { %169 = vmatprep.subr.mxu0 %v203_v1 }
  0x1c   :  { %170 = vmatpush3.msra.mxu0 %v18_v14 }
  0x1d   :  { %171 = vmatprep.subr.mxu0 %v203_v1 }
  0x1e   :  { %172 = vmatpush3.msra.mxu0 %v17_v15 }
  0x1f   :  { %173 = vmatprep.subr.mxu0 %v203_v1 }
  0x20   :  { %174 = vmatpush3.msra.mxu0 %v16_v16 }
  0x21   :  { %176 = vmatmul.mubr.f32.vlgmr.msra.gmra.mxu0 %v15_v17 }
  0xe1   :  { %v105_v19 = vpop.f32.mrf.mxu0 }
  0xe2   :  { %v106_v20 = vadd.f32 %v125_v18, %v105_v19 }
  0xe3   :  { %v177_v21 = vpop.f32.mrf.mxu0 }
  0xe4   :  { %110 = vst.msk [vmem:[#allocation2] sm:$0xff] %vm109_vm1, %v106_v20 }
  0xe5   :  { %192 = shalt.err (!%p189_p4)
}
  0xe6   :  { %120 = dma.vmem_to_hbm [thread:$0]  %s118_s22, 128, %s286_s3, [#allocation3]  }
  0xe7   :  { %201 = dma.done.wait [#allocation3], 128  }
  0xe8   :  { %202 = vsyncadd [#allocation3], 4294967168 }
  0xe9   :  { %124 = vsyncpa [#allocation3], 1 }

</bundles_post_ra>
